<compile_context>
chip_gen: v5e
topology: v5e:2x2
jax: 0.10.0
libtpu: 0.0.40
codegen_flags: <defaults>
</compile_context>

<pallas_src>
import functools

import jax
import jax.numpy as jnp
from jax.experimental import pallas as pl
from jax.experimental.pallas import tpu as pltpu

_LANES = 128
_SUBLANES = 8
_ROW_ALIGN = 16          # block rows legal for both f32 (8) and bf16 (16)
_MAX_TILE_ROWS = 8192    # 8192 rows * 128 lanes * 4 B = 4 MiB per f32 block


def _round_up(x, m):
    return -(-x // m) * m


def _tpu_config():
    """(max_tile_rows, vmem_limit_bytes, requested_cores) per TPU generation."""
    try:
        kind = jax.devices()[0].device_kind.lower()
    except Exception:
        kind = ""
    if "v7" in kind or "tpu7" in kind:
        # 2 TensorCores per chip; 64 MiB physical VMEM per TC -> 48 MiB scoped.
        return _MAX_TILE_ROWS, 48 * 1024 * 1024, 2
    if "v6" in kind or "v5" in kind:
        # 1 TC, 128 MiB physical VMEM (scoped default 16-32 MiB -> raise it).
        return _MAX_TILE_ROWS, 48 * 1024 * 1024, 1
    # Unknown / older chips: small blocks, default scoped-VMEM budget.
    return 2048, None, 1


def _plan(d, max_tile_rows, num_cores):
    """Static tiling plan -> (rows_padded, tile_rows, k_steps, num_cores)."""
    rows = _round_up(-(-d // _LANES), _ROW_ALIGN)
    cap = max(_ROW_ALIGN, (max_tile_rows // _ROW_ALIGN) * _ROW_ALIGN)
    tile_rows = min(rows, cap)
    if rows < 2 * tile_rows:          # not enough work to split across cores
        num_cores = 1
    rows_padded = _round_up(rows, num_cores * tile_rows)
    k_steps = rows_padded // (num_cores * tile_rows)
    return rows_padded, tile_rows, k_steps, num_cores


def _to_lane_layout(v, d, rows_padded):
    """Length-d vector -> zero-padded (rows_padded, 128); native dtype kept."""
    flat = jnp.ravel(v)
    total = rows_padded * _LANES
    if d != total:                    # ragged: pad only the missing tail
        flat = jnp.pad(flat, (0, total - d))
    return flat.reshape(rows_padded, _LANES)   # exact case: zero-copy reshape


def _dot_square_kernel(alpha_ref, z_ref, o_ref):
    # alpha_ref, z_ref: (tile_rows, 128) VMEM blocks in their native dtypes.
    # o_ref: (1, 8, 128) f32 VMEM block -- per-core vreg-shaped accumulator,
    #        resident across the reduction (k) axis of the grid.
    k = pl.program_id(1)

    @pl.when(k == 0)
    def _init():
        o_ref[...] = jnp.zeros_like(o_ref)

    a = alpha_ref[...].astype(jnp.float32)
    z = z_ref[...].astype(jnp.float32)
    prod = a * (z * z)
    tile_rows = prod.shape[0]
    # Fold (tile_rows, 128) -> (8, 128) with pure VPU adds; the expensive
    # cross-lane / cross-sublane reduce happens once, outside the kernel.
    partial = jnp.sum(
        prod.reshape(tile_rows // _SUBLANES, _SUBLANES, _LANES), axis=0)
    o_ref[...] += partial[None]


@functools.partial(
    jax.jit,
    static_argnames=("d", "max_tile_rows", "num_cores", "vmem_limit_bytes"))
def alpha_dot_zsq(alpha2d, z, d, max_tile_rows=_MAX_TILE_ROWS, num_cores=1,
                  vmem_limit_bytes=None):
    """sum(alpha * z**2) -> f32 scalar, matching alpha.dot(z ** 2).

    alpha2d: parameter already in kernel-facing (rows_padded, 128) layout.
    z: length-d vector, any float dtype (kept native through the DMA).
    """
    rows_padded, tile_rows, k_steps, num_cores = _plan(
        d, max_tile_rows, num_cores)
    assert alpha2d.shape == (rows_padded, _LANES), (
        "alpha2d was laid out with a different tiling plan")
    z2d = _to_lane_layout(z, d, rows_padded)

    cp = dict(dimension_semantics=("parallel", "arbitrary"))
    if vmem_limit_bytes is not None:
        cp["vmem_limit_bytes"] = vmem_limit_bytes

    partials = pl.pallas_call(
        _dot_square_kernel,
        out_shape=jax.ShapeDtypeStruct(
            (num_cores, _SUBLANES, _LANES), jnp.float32),
        grid=(num_cores, k_steps),
        in_specs=[
            pl.BlockSpec((tile_rows, _LANES), lambda c, k: (c * k_steps + k, 0)),
            pl.BlockSpec((tile_rows, _LANES), lambda c, k: (c * k_steps + k, 0)),
        ],
        out_specs=pl.BlockSpec((1, _SUBLANES, _LANES), lambda c, k: (c, 0, 0)),
        compiler_params=pltpu.CompilerParams(**cp),
    )(alpha2d, z2d)
    # Tiny (num_cores, 8, 128) cross-lane reduce + cross-core sum.
    return jnp.sum(partials)


class TestModelPallas:
    """Pallas port of TestModel: forward(z) = alpha.dot(z ** 2)."""

    def __init__(self, d, key):
        self.dim = d
        self.max_tile_rows, self.vmem_limit, cores = _tpu_config()
        # torch.randn(1, d) parameter stand-in (kept in f32 like the module).
        self.alpha = jax.random.normal(key, (1, d), dtype=jnp.float32)
        rows_padded, _, _, self.num_cores = _plan(d, self.max_tile_rows, cores)
        # Kernel-facing layout prepared once at construction, not per call.
        self.alpha_2d = _to_lane_layout(self.alpha, d, rows_padded)

    def __call__(self, z):
        return alpha_dot_zsq(self.alpha_2d, z, self.dim,
                             max_tile_rows=self.max_tile_rows,
                             num_cores=self.num_cores,
                             vmem_limit_bytes=self.vmem_limit)


if __name__ == "__main__":
    key = jax.random.PRNGKey(0)
    k_alpha, k_z, k2a, k2z, k3a, k3z, k4a, k4z = jax.random.split(key, 8)

    # --- Small shape consistent with the module (hidden d = 32) ---
    d = 32
    model = TestModelPallas(d, k_alpha)
    z = jax.random.normal(k_z, (d,), dtype=jnp.float32)
    out = jax.block_until_ready(model(z))
    ref = jnp.sum(model.alpha.reshape(-1) * (z ** 2))
    assert jnp.allclose(out, ref, rtol=1e-5, atol=1e-5), (out, ref)

    # --- Multi-step accumulator path (ragged d, tiny forced tile) ---
    d2 = 5000
    alpha2 = jax.random.normal(k2a, (1, d2), dtype=jnp.float32)
    z2 = jax.random.normal(k2z, (d2,), dtype=jnp.float32)
    rows2, _, _, _ = _plan(d2, 16, 1)
    out2 = jax.block_until_ready(
        alpha_dot_zsq(_to_lane_layout(alpha2, d2, rows2), z2, d2,
                      max_tile_rows=16, num_cores=1))
    ref2 = jnp.sum(alpha2.reshape(-1) * (z2 ** 2))
    assert jnp.allclose(out2, ref2, rtol=1e-3, atol=1e-2), (out2, ref2)

    # --- Two-core (v7x-style) grid path; also correct on 1-TC chips ---
    d3 = 100_000
    alpha3 = jax.random.normal(k3a, (1, d3), dtype=jnp.float32)
    z3 = jax.random.normal(k3z, (d3,), dtype=jnp.float32)
    rows3, _, _, _ = _plan(d3, 64, 2)
    out3 = jax.block_until_ready(
        alpha_dot_zsq(_to_lane_layout(alpha3, d3, rows3), z3, d3,
                      max_tile_rows=64, num_cores=2))
    ref3 = jnp.sum(alpha3.reshape(-1) * (z3 ** 2))
    assert jnp.allclose(out3, ref3, rtol=1e-3, atol=0.2), (out3, ref3)

    # --- bf16 z path (narrow dtype through the DMA, upcast in-kernel) ---
    d4 = 2048
    alpha4 = jax.random.normal(k4a, (1, d4), dtype=jnp.float32)
    z4 = jax.random.normal(k4z, (d4,), dtype=jnp.bfloat16)
    rows4, _, _, _ = _plan(d4, _MAX_TILE_ROWS, 1)
    out4 = jax.block_until_ready(
        alpha_dot_zsq(_to_lane_layout(alpha4, d4, rows4), z4, d4))
    ref4 = jnp.sum(alpha4.reshape(-1) * (z4.astype(jnp.float32) ** 2))
    assert jnp.allclose(out4, ref4, rtol=1e-3, atol=1e-2), (out4, ref4)

    print("KERNEL_OK")
</pallas_src>

<mosaic_0001>
module attributes {stable_mosaic.version = 11 : i64} {
  func.func @_dot_square_kernel(%arg0: i32, %arg1: i32, %arg2: memref<16x128xf32, #tpu.memory_space<vmem>>, %arg3: memref<16x128xf32, #tpu.memory_space<vmem>>, %arg4: memref<1x8x128xf32, #tpu.memory_space<vmem>>) attributes {dimension_semantics = [#tpu.dimension_semantics<parallel>, #tpu.dimension_semantics<arbitrary>], iteration_bounds = array<i64: 1, 1>, scalar_prefetch = 0 : i64, scratch_operands = 0 : i64, tpu.core_type = #tpu.core_type<tc>, window_params = [{transform_indices = @transform_0, window_bounds = array<i64: 16, 128>}, {transform_indices = @transform_1, window_bounds = array<i64: 16, 128>}, {transform_indices = @transform_2, window_bounds = array<i64: 1, 8, 128>}]} {
    %c0_i32 = arith.constant 0 : i32
    %0 = arith.cmpi eq, %arg1, %c0_i32 : i32
    %1 = arith.extui %0 : i1 to i32
    %c0_i32_0 = arith.constant 0 : i32
    %2 = arith.cmpi ne, %1, %c0_i32_0 : i32
    scf.if %2 {
      %cst_10 = arith.constant 0.000000e+00 : f32
      %13 = vector.broadcast %cst_10 : f32 to vector<1x8x128xf32>
      %c0_11 = arith.constant 0 : index
      %c0_12 = arith.constant 0 : index
      %c0_13 = arith.constant 0 : index
      %14 = vector.load %arg4[%c0_11, %c0_12, %c0_13] : memref<1x8x128xf32, #tpu.memory_space<vmem>>, vector<1x8x128xf32>
      tpu.vector_store %arg4[%c0_11, %c0_12, %c0_13], %13 {strides = array<i32>} : memref<1x8x128xf32, #tpu.memory_space<vmem>>, vector<1x8x128xf32>,
    } else {
    }
    %c0 = arith.constant 0 : index
    %c0_1 = arith.constant 0 : index
    %3 = vector.load %arg2[%c0, %c0_1] : memref<16x128xf32, #tpu.memory_space<vmem>>, vector<16x128xf32>
    %c0_2 = arith.constant 0 : index
    %c0_3 = arith.constant 0 : index
    %4 = vector.load %arg3[%c0_2, %c0_3] : memref<16x128xf32, #tpu.memory_space<vmem>>, vector<16x128xf32>
    %5 = arith.mulf %4, %4 : vector<16x128xf32>
    %6 = arith.mulf %3, %5 : vector<16x128xf32>
    %7 = vector.shape_cast %6 : vector<16x128xf32> to vector<2x8x128xf32>
    %cst = arith.constant dense<0.000000e+00> : vector<8x128xf32>
    %8 = vector.multi_reduction <add>, %7, %cst [0] : vector<2x8x128xf32> to vector<8x128xf32>
    %c0_4 = arith.constant 0 : index
    %c0_5 = arith.constant 0 : index
    %c0_6 = arith.constant 0 : index
    %9 = vector.load %arg4[%c0_4, %c0_5, %c0_6] : memref<1x8x128xf32, #tpu.memory_space<vmem>>, vector<1x8x128xf32>
    %10 = vector.shape_cast %8 : vector<8x128xf32> to vector<1x8x128xf32>
    %11 = arith.addf %9, %10 : vector<1x8x128xf32>
    %c0_7 = arith.constant 0 : index
    %c0_8 = arith.constant 0 : index
    %c0_9 = arith.constant 0 : index
    %12 = vector.load %arg4[%c0_7, %c0_8, %c0_9] : memref<1x8x128xf32, #tpu.memory_space<vmem>>, vector<1x8x128xf32>
    tpu.vector_store %arg4[%c0_7, %c0_8, %c0_9], %11 {strides = array<i32>} : memref<1x8x128xf32, #tpu.memory_space<vmem>>, vector<1x8x128xf32>,
    return
  }
  func.func @transform_0(%arg0: i32, %arg1: i32) -> (i32, i32) {
    %c1_i32 = arith.constant 1 : i32
    %0 = arith.muli %arg0, %c1_i32 : i32
    %1 = arith.addi %0, %arg1 : i32
    %c0_i32 = arith.constant 0 : i32
    %c0_i32_0 = arith.constant 0 : i32
    return %1, %c0_i32 : i32, i32
  }
  func.func @transform_1(%arg0: i32, %arg1: i32) -> (i32, i32) {
    %c1_i32 = arith.constant 1 : i32
    %0 = arith.muli %arg0, %c1_i32 : i32
    %1 = arith.addi %0, %arg1 : i32
    %c0_i32 = arith.constant 0 : i32
    %c0_i32_0 = arith.constant 0 : i32
    return %1, %c0_i32 : i32, i32
  }
  func.func @transform_2(%arg0: i32, %arg1: i32) -> (i32, i32, i32) {
    %c0_i32 = arith.constant 0 : i32
    %c0_i32_0 = arith.constant 0 : i32
    %c0_i32_1 = arith.constant 0 : i32
    return %arg0, %c0_i32, %c0_i32_0 : i32, i32, i32
  }
}

</mosaic_0001>

<bundles_post_ra>
// kernel: alpha_dot_zsq.1
= control target key start
LH: loop header
LB: loop body
LE: loop exit
PB: predicated region body
PF: predicated region fallthrough
CT: control target
= control target key end

     0   :  { %s119_s0 = inlined_call_operand.vmem [shape: f32[16,128], index: 0, kind: input, shape index: {}]   ;;  %s120_s1 = inlined_call_operand.vmem [shape: f32[16,128], index: 1, kind: input, shape index: {}]   ;;  %s121_s2 = inlined_call_operand.vmem [shape: f32[1,8,128], index: 2, kind: output, shape index: {}]  }
   0x1   :  { %v60_v0 = vld [vmem:[%s119_s0] sm:$0xff]  ;;  %v61_v2 = vld [vmem:[%s119_s0 + $0x8] sm:$0xff] }
   0x2   :  { %v62_v1 = vld [vmem:[%s120_s1] sm:$0xff]  ;;  %v63_v3 = vld [vmem:[%s120_s1 + $0x8] sm:$0xff] }
   0x3   :  { %v64_v4 = vmul.f32 %v62_v1, %v62_v1  ;;  %v65_v5 = vmul.f32 %v63_v3, %v63_v3 }
   0x5   :  { %v66_v6 = vmul.f32 %v64_v4, %v60_v0  ;;  %v67_v7 = vmul.f32 %v65_v5, %v61_v2 }
   0x7   :  { %v68_v8 = vadd.f32 %v67_v7, %v66_v6 }
   0x9   :  { %71 = vst [vmem:[%s121_s2] sm:$0xff] %v68_v8 }

</bundles_post_ra>
